<compile_context>
chip_gen: v5e
topology: v5e:2x2
jax: 0.10.0
libtpu: 0.0.40
codegen_flags: <defaults>
</compile_context>

<pallas_src>
import jax
import jax.numpy as jnp
from jax.experimental import pallas as pl
from jax.experimental.pallas import tpu as pltpu

KSIZE = 7
PAD = (KSIZE - 1) // 2


def _conv7x7_operator(ws, H, W):
    """Dense (H*W, H*W) operator of a 7x7 'same' (zero-pad 3) cross-correlation.

    out_flat = comp_flat @ K   with
      K[r*W + c, h*W + w] = ws[r-h+3, c-w+3]  when |r-h| <= 3 and |c-w| <= 3, else 0.
    This matches PyTorch Conv2d (cross-correlation, zero padding 3, stride 1).
    """
    ws = ws.astype(jnp.float32)
    di = jnp.arange(H)[:, None] - jnp.arange(H)[None, :] + PAD      # (H, H): r - h + 3
    dj = jnp.arange(W)[:, None] - jnp.arange(W)[None, :] + PAD      # (W, W): c - w + 3
    vi = (di >= 0) & (di < KSIZE)
    vj = (dj >= 0) & (dj < KSIZE)
    taps = ws[jnp.clip(di, 0, KSIZE - 1)[:, None, :, None],
              jnp.clip(dj, 0, KSIZE - 1)[None, :, None, :]]          # (H, W, H, W)
    k4 = jnp.where(vi[:, None, :, None] & vj[None, :, None, :], taps, 0.0)
    return k4.reshape(H * W, H * W)


def spatial_gate_kernel(bn_ref, wc_ref, k_ref, x_ref, o_ref):
    # bn_ref: (2,)      SMEM  -- folded BatchNorm [scale, shift] (eval mode)
    # wc_ref: (1, C)    VMEM  -- 1x1 compress-conv weights (out=1, in=C)
    # k_ref : (HW, HW)  VMEM  -- dense 7x7 conv operator on the flattened plane
    # x_ref : (C, HW)   VMEM  -- one batch element, lane-dense last dim
    # o_ref : (C, HW)   VMEM
    f32 = jnp.float32

    # --- 1x1 conv: channel-weighted sum on the MXU -> (1, HW) ---
    comp = jnp.dot(wc_ref[...], x_ref[...], preferred_element_type=f32)

    # --- 7x7 'same' conv as a single matmul against the banded operator (MXU) ---
    conv = jnp.dot(comp, k_ref[...], preferred_element_type=f32)

    # --- BatchNorm (eval mode, folded) + sigmoid gate ---
    # TODO(synk): BatchNorm applied in eval mode (running stats); training-mode batch stats not modeled.
    y = conv * bn_ref[0] + bn_ref[1]
    gate = pl.reciprocal(1.0 + jnp.exp(-y), approx=False)            # (1, HW)

    # --- gate broadcast over channels; re-read x_ref so no big f32 slab stays live ---
    o_ref[...] = (x_ref[...] * gate).astype(o_ref.dtype)


def spatial_gate1(x, wc, ws, bn):
    N, C, H, W = x.shape
    HW = H * W

    # Lane-dense layout: fold H, W into one trailing dim (free row-major reshape).
    x_flat = x.reshape(N, C, HW)
    wc2d = wc.reshape(1, C).astype(jnp.float32)
    bn = bn.astype(jnp.float32)
    K = _conv7x7_operator(ws, H, W)

    out_flat = pl.pallas_call(
        spatial_gate_kernel,
        out_shape=jax.ShapeDtypeStruct((N, C, HW), x.dtype),
        grid=(N,),
        in_specs=[
            pl.BlockSpec(memory_space=pltpu.MemorySpace.SMEM),     # bn (2,)
            pl.BlockSpec((1, C), lambda n: (0, 0)),                # wc (1, C)  VMEM
            pl.BlockSpec((HW, HW), lambda n: (0, 0)),              # K (HW, HW) VMEM
            pl.BlockSpec((None, C, HW), lambda n: (n, 0, 0)),      # x (C, HW)
        ],
        out_specs=pl.BlockSpec((None, C, HW), lambda n: (n, 0, 0)),
        compiler_params=pltpu.CompilerParams(
            dimension_semantics=("parallel",)),
    )(bn, wc2d, K, x_flat)
    return out_flat.reshape(N, C, H, W)


def spatial_gate1_reference(x, wc, ws, bn):
    # Pure-JAX reference for validation.
    comp = jnp.einsum('nchw,c->nhw', x, wc)[:, None]                # (N,1,H,W)
    conv = jax.lax.conv_general_dilated(
        comp, ws[None, None],
        window_strides=(1, 1), padding=((PAD, PAD), (PAD, PAD)),
        dimension_numbers=('NCHW', 'OIHW', 'NCHW'))
    y = conv * bn[0] + bn[1]
    return x * jax.nn.sigmoid(y)


if __name__ == "__main__":
    N, C, H, W = 2, 4, 16, 16
    key = jax.random.PRNGKey(0)
    k_x, k_wc, k_ws = jax.random.split(key, 3)

    x = jax.random.normal(k_x, (N, C, H, W), jnp.float32)

    # Deterministic synthetic parameters (shapes from __init__):
    #   compress: Conv2d(C, 1, 1, bias=False) -> weight (1, C, 1, 1) -> stored as (C,)
    #   spatial : Conv2d(1, 1, 7, pad=3, bias=False) -> weight (1, 1, 7, 7) -> (7, 7)
    #   BatchNorm2d(1): gamma=1, beta=0, running_mean=0, running_var=1, eps=1e-5
    wc = 0.5 * jax.random.normal(k_wc, (C,), jnp.float32)
    ws = 0.1 * jax.random.normal(k_ws, (KSIZE, KSIZE), jnp.float32)
    gamma, beta, r_mean, r_var, eps = 1.0, 0.0, 0.0, 1.0, 1e-5
    bn_scale = gamma / (r_var + eps) ** 0.5
    bn = jnp.array([bn_scale, beta - r_mean * bn_scale], jnp.float32)

    out = spatial_gate1(x, wc, ws, bn)
    out = jax.block_until_ready(out)

    ref = spatial_gate1_reference(x, wc, ws, bn)
    assert out.shape == (N, C, H, W)
    assert jnp.allclose(out, ref, atol=1e-5, rtol=1e-5), "mismatch vs reference"

    print("KERNEL_OK")
</pallas_src>

<mosaic_0001>
module attributes {stable_mosaic.version = 11 : i64} {
  func.func @spatial_gate_kernel(%arg0: i32, %arg1: memref<2xf32, #tpu.memory_space<smem>>, %arg2: memref<1x4xf32, #tpu.memory_space<vmem>>, %arg3: memref<256x256xf32, #tpu.memory_space<vmem>>, %arg4: memref<1x4x256xf32, #tpu.memory_space<vmem>>, %arg5: memref<1x4x256xf32, #tpu.memory_space<vmem>>) attributes {dimension_semantics = [#tpu.dimension_semantics<parallel>], iteration_bounds = array<i64: 2>, scalar_prefetch = 0 : i64, scratch_operands = 0 : i64, tpu.core_type = #tpu.core_type<tc>, window_params = [{transform_indices = @transform_0, window_bounds = array<i64: 2>}, {pipeline_mode = #tpu.pipeline_mode<synchronous>, transform_indices = @transform_1, window_bounds = array<i64: 1, 4>}, {pipeline_mode = #tpu.pipeline_mode<synchronous>, transform_indices = @transform_2, window_bounds = array<i64: 256, 256>}, {transform_indices = @transform_3, window_bounds = array<i64: 1, 4, 256>}, {transform_indices = @transform_4, window_bounds = array<i64: 1, 4, 256>}]} {
    %c0 = arith.constant 0 : index
    %c0_0 = arith.constant 0 : index
    %0 = vector.load %arg2[%c0, %c0_0] : memref<1x4xf32, #tpu.memory_space<vmem>>, vector<1x4xf32>
    %c0_1 = arith.constant 0 : index
    %c0_2 = arith.constant 0 : index
    %c0_3 = arith.constant 0 : index
    %1 = vector.load %arg4[%c0_1, %c0_2, %c0_3] : memref<1x4x256xf32, #tpu.memory_space<vmem>>, vector<1x4x256xf32>
    %2 = vector.shape_cast %1 : vector<1x4x256xf32> to vector<4x256xf32>
    %cst = arith.constant dense<0.000000e+00> : vector<1x256xf32>
    %3 = tpu.matmul %0, %2, %cst {dimension_numbers = #tpu.dot_dimension_numbers<[1], [0], [0], [1], [0, 0, 1, 1], [], []>} : vector<1x4xf32>, vector<4x256xf32>, vector<1x256xf32> -> vector<1x256xf32>
    %c0_4 = arith.constant 0 : index
    %c0_5 = arith.constant 0 : index
    %4 = vector.load %arg3[%c0_4, %c0_5] : memref<256x256xf32, #tpu.memory_space<vmem>>, vector<256x256xf32>
    %cst_6 = arith.constant dense<0.000000e+00> : vector<1x256xf32>
    %5 = tpu.matmul %3, %4, %cst_6 {dimension_numbers = #tpu.dot_dimension_numbers<[1], [0], [0], [1], [0, 0, 1, 1], [], []>} : vector<1x256xf32>, vector<256x256xf32>, vector<1x256xf32> -> vector<1x256xf32>
    %c0_7 = arith.constant 0 : index
    %6 = memref.load %arg1[%c0_7] : memref<2xf32, #tpu.memory_space<smem>>
    %7 = vector.broadcast %6 : f32 to vector<1x256xf32>
    %8 = arith.mulf %5, %7 : vector<1x256xf32>
    %c1 = arith.constant 1 : index
    %9 = memref.load %arg1[%c1] : memref<2xf32, #tpu.memory_space<smem>>
    %10 = vector.broadcast %9 : f32 to vector<1x256xf32>
    %11 = arith.addf %8, %10 : vector<1x256xf32>
    %cst_8 = arith.constant 0.000000e+00 : f32
    %12 = vector.broadcast %cst_8 : f32 to vector<1x256xf32>
    %13 = arith.subf %12, %11 : vector<1x256xf32>
    %14 = math.exp %13 : vector<1x256xf32>
    %cst_9 = arith.constant 1.000000e+00 : f32
    %15 = vector.broadcast %cst_9 : f32 to vector<1x256xf32>
    %16 = arith.addf %15, %14 : vector<1x256xf32>
    %17 = tpu.reciprocal %16 : vector<1x256xf32> -> vector<1x256xf32>
    %c0_10 = arith.constant 0 : index
    %c0_11 = arith.constant 0 : index
    %c0_12 = arith.constant 0 : index
    %18 = vector.load %arg4[%c0_10, %c0_11, %c0_12] : memref<1x4x256xf32, #tpu.memory_space<vmem>>, vector<1x4x256xf32>
    %19 = vector.shape_cast %18 : vector<1x4x256xf32> to vector<4x256xf32>
    %20 = vector.broadcast %17 : vector<1x256xf32> to vector<4x256xf32>
    %21 = arith.mulf %19, %20 : vector<4x256xf32>
    %c0_13 = arith.constant 0 : index
    %c0_14 = arith.constant 0 : index
    %c0_15 = arith.constant 0 : index
    %22 = vector.load %arg5[%c0_13, %c0_14, %c0_15] : memref<1x4x256xf32, #tpu.memory_space<vmem>>, vector<1x4x256xf32>
    %23 = vector.shape_cast %22 : vector<1x4x256xf32> to vector<4x256xf32>
    %24 = vector.shape_cast %21 : vector<4x256xf32> to vector<1x4x256xf32>
    tpu.vector_store %arg5[%c0_13, %c0_14, %c0_15], %24 {strides = array<i32>} : memref<1x4x256xf32, #tpu.memory_space<vmem>>, vector<1x4x256xf32>,
    return
  }
  func.func @transform_0(%arg0: i32) -> i32 {
    %c0_i32 = arith.constant 0 : i32
    %c0_i32_0 = arith.constant 0 : i32
    return %c0_i32 : i32
  }
  func.func @transform_1(%arg0: i32) -> (i32, i32) {
    %c0_i32 = arith.constant 0 : i32
    %c0_i32_0 = arith.constant 0 : i32
    %c0_i32_1 = arith.constant 0 : i32
    return %c0_i32, %c0_i32_0 : i32, i32
  }
  func.func @transform_2(%arg0: i32) -> (i32, i32) {
    %c0_i32 = arith.constant 0 : i32
    %c0_i32_0 = arith.constant 0 : i32
    %c0_i32_1 = arith.constant 0 : i32
    return %c0_i32, %c0_i32_0 : i32, i32
  }
  func.func @transform_3(%arg0: i32) -> (i32, i32, i32) {
    %c0_i32 = arith.constant 0 : i32
    %c0_i32_0 = arith.constant 0 : i32
    %c0_i32_1 = arith.constant 0 : i32
    return %arg0, %c0_i32, %c0_i32_0 : i32, i32, i32
  }
  func.func @transform_4(%arg0: i32) -> (i32, i32, i32) {
    %c0_i32 = arith.constant 0 : i32
    %c0_i32_0 = arith.constant 0 : i32
    %c0_i32_1 = arith.constant 0 : i32
    return %arg0, %c0_i32, %c0_i32_0 : i32, i32, i32
  }
}

</mosaic_0001>

<bundles_post_ra>
// kernel: tpu_custom_call.1
= control target key start
LH: loop header
LB: loop body
LE: loop exit
PB: predicated region body
PF: predicated region fallthrough
CT: control target
= control target key end

     0   :  { %9 = vsyncpa [#allocation5], 0  ;;  %s1124_s0 = inlined_call_operand.hbm [shape: f32[2], index: 0, kind: input, shape index: {}]   ;;  %s1125_s1 = inlined_call_operand.hbm [shape: f32[1,4], index: 1, kind: input, shape index: {}]   ;;  %s1126_s2 = inlined_call_operand.hbm [shape: f32[256,256], index: 2, kind: input, shape index: {}]   ;;  %s1127_s3 = inlined_call_operand.hbm [shape: f32[2,4,256], index: 3, kind: input, shape index: {}]   ;;  %s1128_s4 = inlined_call_operand.hbm [shape: f32[2,4,256], index: 4, kind: output, shape index: {}]  }
   0x1   :  { %10 = vsyncpa [#allocation3], 0 }
   0x2   :  { %11 = vsyncpa [#allocation8], 0 }
   0x3   :  { %12 = vsyncpa [#allocation4], 0 }
   0x4   :  { %14 = vsyncpa [#allocation4 + $0x1], 0  ;;  %s958_s15 = smov 0   ;;  %s960_s16 = smov 0  }
   0x5   :  { %s962_s17 = smov 0   ;;  %s964_s18 = smov 0  }
   0x6 LB: > { %s979_s19 = sadd.s32 4294967295, %s926_s18   ;;  %s629_s20 = sadd.s32 4294967294, %s926_s18   ;;  %s926_s18 = sphi %s964_s18, %s1138_s18   ;;  %s922_s17 = sphi %s962_s17, %s1137_s17   ;;  %s918_s16 = sphi %s960_s16, %s1136_s16   ;;  %s914_s15 = sphi %s958_s15, %s1135_s15  }
   0x7   : > { %p103_p0 = scmp.ne.s32.totalorder %s918_s16, %s914_s15  ;;  %p104_p1 = scmp.eq.s32.totalorder %s979_s19, 0 }
   0x8   : > { %p127_p2 = scmp.eq.s32.totalorder %s979_s19, 1  ;;  %p133_p3 = scmp.eq.s32.totalorder %s629_s20, 1 }
   0x9   : > { %p988_p4 = por %p104_p1, %p103_p0  ;;  %p630_p5 = scmp.ge.s32.totalorder %s926_s18, 1 }
   0xa   : > { %p993_p6 = por %p133_p3, %p103_p0  ;;  %p140_p7 = scmp.lt.s32.totalorder %s926_s18, 3 }
   0xb   : > { %s162_s25 = sshll.u32 %s1125_s1, 4  ;;  %s928_s27 = smov [#allocation6]   ;;  %s163_s25 = int_to_ptr.hbm [resolvable:$true] %s162_s25 }
   0xc   : > { %p1001_p8 = pnand %p630_p5, %p140_p7  ;;  %s164_s28 = sshll.u32 %s928_s27, 4  ;;  %s165_s28 = int_to_ptr.vmem [resolvable:$true] %s164_s28 }
   0xd   : > { %s152_s5 = sshll.u32 %s1124_s0, 4  ;;  %s173_s8 = sshll.u32 %s1126_s2, 4  ;;  %s153_s5 = int_to_ptr.hbm [resolvable:$true] %s152_s5  ;;  %s174_s8 = int_to_ptr.hbm [resolvable:$true] %s173_s8 }
   0xe   : > { %p672_p10 = pneg %p1001_p8  ;;  %s929_s9 = smov [#allocation2]  }
   0xf   : > { %s930_s10 = smov [#allocation7]   ;;  %s931_s12 = smov 256  }
  0x10   : > { %p673_p11 = pnand %p672_p10, %p104_p1  ;;  %s175_s11 = sshll.u32 %s930_s10, 4  ;;  %s176_s11 = int_to_ptr.vmem [resolvable:$true] %s175_s11 }
  0x11   : > { %s932_s13 = smov 16   ;;  %s1017_s14 = sadd.s32 1, %s926_s18  }
  0x12   : > { %678 = dma.hbm_to_vmem [thread:$0]  (!%p673_p11), %s163_s25, 16, %s165_s28, [#allocation3]  }
  0x13   : > { %675 = dma.hbm_to_smem (!%p673_p11), %s153_s5, 16, %s929_s9, [#allocation5]  }
  0x14   : > { %681 = dma.hbm_to_vmem [thread:$0]  (!%p673_p11), %s174_s8, 8192, %s176_s11, [#allocation8], %s931_s12, %s931_s12, %s932_s13  }
  0x15   : > { %s87_s20 = ssub.s32 %s926_s18, %s1017_s14  ;;  %s90_s23 = sadd.s32 1, %s922_s17 }
  0x16   : > { %p88_p12 = scmp.eq.s32.totalorder %s87_s20, 0  ;;  %p97_p13 = scmp.ne.s32.totalorder %s922_s17, %s918_s16 }
  0x17   : > { %p98_p0 = scmp.eq.s32.totalorder %s926_s18, 0  ;;  %p693_p3 = scmp.lt.s32.totalorder %s926_s18, 2 }
  0x18   : > { %s1027_s24 = scalar_select %p88_p12, %s922_s17, %s90_s23  }
  0x19   : > { %p99_p5 = por %p98_p0, %p97_p13  ;;  %p1031_p7 = por %p127_p2, %p97_p13 }
  0x1a   : > { %s189_s27 = sand.u32 1, %s926_s18   ;;  %s191_s28 = sand.u32 1, %s922_s17  }
  0x1b   : > { %s635_s29 = sshll.u32 %s191_s28, 3  ;;  %s654_s30 = sshll.u32 %s926_s18, 3 }
  0x1c   : > { %s198_s7 = scalar_lea.hbm %s1127_s3, %s654_s30  ;;  %s193_s8 = scalar_lea.vmem [#allocation9], %s635_s29 }
  0x1d   : > { %s202_s9 = sshll.u32 %s193_s8, 4  ;;  %s200_s10 = sshll.u32 %s198_s7, 4  ;;  %s203_s9 = int_to_ptr.vmem [resolvable:$true] %s202_s9  ;;  %s201_s10 = int_to_ptr.hbm [resolvable:$true] %s200_s10 }
  0x1e   : > { %p1043_p10 = pnand %p693_p3, %p99_p5  ;;  %s190_s12 = scalar_lea.sflag [#allocation3], %s189_s27 }
  0x1f   : > { %s818_s13 = sshra.s32 %s201_s10, 4  ;;  %s825_s29 = scalar_lea.hbm %s1127_s3, 16  ;;  %s819_s13 = int_to_ptr.hbm [resolvable:$true] %s818_s13 }
  0x20   : > { %s820_s20 = scalar_lea.hbm %s819_s13, 8  ;;  %p822_p11 = pneg %p1043_p10 }
  0x21   : > { %p821_p2 = scmp.ne.s32.totalorder %s819_s13, %s820_s20  ;;  %p826_p0 = scmp.lt.s32.totalorder %s819_s13, %s1127_s3 }
  0x22   : > { %p827_p3 = scmp.lt.s32.totalorder %s825_s29, %s820_s20 }
  0x23   : > { %p823_p12 = pnand %p822_p11, %p821_p2 }
  0x24   : > { %p828_p5 = por %p827_p3, %p826_p0 }
  0x25   : > { %p824_p13 = pneg %p823_p12 }
  0x27   : > { %p829_p9 = pnand %p828_p5, %p824_p13 }
  0x29   : > { %832 = shalt.err (!%p829_p9)
}
  0x2a   : > { %685 = dma.hbm_to_vmem [thread:$0]  (!%p1043_p10), %s201_s10, 128, %s203_s9, %s190_s12  }
  0x2b   : > { %211 = sbr.rel (%p1001_p8) target bundleno = 371 (0x173), region = 36 }
  0x30   : > { %893 = dma.done.wait (%p104_p1), [#allocation5], 16  }
  0x31   : > { %895 = vsyncadd (%p104_p1), [#allocation5], 4294967280 }
  0x32   : > { %897 = dma.done.wait (%p104_p1), [#allocation3], 16  }
  0x33   : > { %899 = vsyncadd (%p104_p1), [#allocation3], 4294967280 }
  0x34   : > { %901 = dma.done.wait (%p104_p1), [#allocation8], 8192  }
  0x35   : > { %903 = vsyncadd (%p104_p1), [#allocation8], 4294959104  ;;  %s228_s26 = sand.u32 1, %s979_s19   ;;  %s230_s27 = sand.u32 1, %s918_s16  }
  0x36   : > { %s1075_s6 = sshll.u32 %s230_s27, 3  ;;  %s229_s7 = scalar_lea.sflag [#allocation3], %s228_s26 }
  0x37   : > { %s232_s8 = scalar_lea.vmem [#allocation9], %s1075_s6 }
  0x38   : > { %905 = dma.done.wait (%p988_p4), %s229_s7, 128  }
  0x39   : > { %907 = vsyncadd (%p988_p4), %s229_s7, 4294967168 }
  0x3a   : > { %238 = sfence }
  0x3b   : > { %v1082_v0 = vld [vmem:[%s232_s8] sm:$0xff]  ;;  %v344_v1 = vld [vmem:[#allocation7 + $0xf0] sm:$0xff]  ;;  %vm269_vm0 = vcmask 1043456   ;;  %v259_v9 = vld [vmem:[#allocation6] sm:$0x1]  ;;  %vm265_vm1 = vcmask 31744  }
  0x3c   : > { %262 = vst [vmem:[#allocation1] ss:$2 sm:$0xff] %v1082_v0  ;;  %378 = vmatpush.msra.mxu2 %v344_v1  ;;  %v376_v2 = vld [vmem:[#allocation7 + $0x1f0] sm:$0xff]  ;;  %v342_v3 = vld [vmem:[#allocation7 + $0xe0] sm:$0xff]  ;;  %v345_v10 = vld [vmem:[#allocation7 + $0xf8] sm:$0xff]  ;;  %s458_s21 = sld [smem:[#allocation2]] }
  0x3d   : > { %398 = vmatpush.msra.mxu3 %v376_v2  ;;  %v374_v4 = vld [vmem:[#allocation7 + $0x1e0] sm:$0xff]  ;;  %v340_v5 = vld [vmem:[#allocation7 + $0xd0] sm:$0xff]  ;;  %v377_v11 = vld [vmem:[#allocation7 + $0x1f8] sm:$0xff]  ;;  %s648_s9 = sld [smem:[#allocation2 + $0x1]]  ;;  %s655_s10 = sshll.u32 %s979_s19, 3 }
  0x3e   : > { %379 = vmatpush.msra.mxu2 %v342_v3  ;;  %v372_v6 = vld [vmem:[#allocation7 + $0x1d0] sm:$0xff]  ;;  %v338_v7 = vld [vmem:[#allocation7 + $0xc0] sm:$0xff]  ;;  %v343_v16 = vld [vmem:[#allocation7 + $0xe8] sm:$0xff]  ;;  %s523_s13 = scalar_lea.hbm %s1128_s4, %s655_s10  ;;  %s258_s20 = scalar_lea.vmem [#allocation10], %s1075_s6 }
  0x3f   : > { %399 = vmatpush.msra.mxu3 %v374_v4  ;;  %v370_v8 = vld [vmem:[#allocation7 + $0x1c0] sm:$0xff]  ;;  %v336_v14 = vld [vmem:[#allocation7 + $0xb0] sm:$0xff]  ;;  %v375_v17 = vld [vmem:[#allocation7 + $0x1e8] sm:$0xff]  ;;  %s525_s23 = sshll.u32 %s258_s20, 4  ;;  %s527_s28 = sshll.u32 %s523_s13, 4  ;;  %s526_s23 = int_to_ptr.vmem [resolvable:$true] %s525_s23  ;;  %s528_s28 = int_to_ptr.hbm [resolvable:$true] %s527_s28 }
  0x40   : > { %380 = vmatpush.msra.mxu2 %v340_v5  ;;  %v368_v15 = vld [vmem:[#allocation7 + $0x1b0] sm:$0xff]  ;;  %v334_v18 = vld [vmem:[#allocation7 + $0xa0] sm:$0xff]  ;;  %v341_v20 = vld [vmem:[#allocation7 + $0xd8] sm:$0xff]  ;;  %s512_s19 = scalar_lea.sflag [#allocation4], %s230_s27  ;;  %s862_s29 = sshra.s32 %s528_s28, 4  ;;  %s863_s29 = int_to_ptr.hbm [resolvable:$true] %s862_s29 }
  0x41   : > { %400 = vmatpush.msra.mxu3 %v372_v6  ;;  %v366_v19 = vld [vmem:[#allocation7 + $0x1a0] sm:$0xff]  ;;  %v373_v21 = vld [vmem:[#allocation7 + $0x1d8] sm:$0xff]  ;;  %v332_v22 = vld [vmem:[#allocation7 + $0x90] sm:$0xff]  ;;  %s864_s30 = scalar_lea.hbm %s863_s29, 8  ;;  %s868_s6 = scalar_lea.hbm %s1128_s4, 16 }
  0x42   : > { %381 = vmatpush.msra.mxu2 %v338_v7  ;;  %v364_v23 = vld [vmem:[#allocation7 + $0x190] sm:$0xff]  ;;  %v339_v24 = vld [vmem:[#allocation7 + $0xc8] sm:$0xff]  ;;  %v330_v26 = vld [vmem:[#allocation7 + $0x80] sm:$0xff]  ;;  %p865_p1 = scmp.ne.s32.totalorder %s863_s29, %s864_s30  ;;  %p869_p9 = scmp.lt.s32.totalorder %s863_s29, %s1128_s4 }
  0x43   : > { %v263_v12 = vld.sshfl [vmem:[#allocation1] sm:$0xff pattern:$0x75316420]  ;;  %v264_v13 = vld.sshfl [vmem:[#allocation1 + $0x8] sm:$0xff pattern:$0x75316420]  ;;  %401 = vmatpush.msra.mxu3 %v370_v8  ;;  %p870_p10 = scmp.lt.s32.totalorder %s868_s6, %s864_s30 }
  0x44   : > { %644 = vmatpush.msk.msra.mxu0 %vm269_vm0, %v263_v12  ;;  %646 = vmatpush.msk.msra.mxu1 %vm269_vm0, %v264_v13  ;;  %v371_v25 = vld [vmem:[#allocation7 + $0x1c8] sm:$0xff]  ;;  %v362_v27 = vld [vmem:[#allocation7 + $0x180] sm:$0xff]  ;;  %v337_v28 = vld [vmem:[#allocation7 + $0xb8] sm:$0xff]  ;;  %p866_p4 = pnand %p865_p1, %p1031_p7 }
  0x45   : > { %645 = vmatmul.msk.f32.vlgmr.msra.gmra.mxu0 %vm265_vm1, %v259_v9  ;;  %647 = vmatmul.msk.f32.vlgmr.msra.gmra.mxu1 %vm265_vm1, %v259_v9  ;;  %v369_v29 = vld [vmem:[#allocation7 + $0x1b8] sm:$0xff]  ;;  %v328_v30 = vld [vmem:[#allocation7 + $0x70] sm:$0xff]  ;;  %v335_v32 = vld [vmem:[#allocation7 + $0xa8] sm:$0xff]  ;;  %v459_v9 = vstv %s458_s21  ;;  %p871_p2 = por %p870_p10, %p869_p9 }
  0x46   : > { %418 = vmatpush.msrb.mxu0 %v345_v10  ;;  %438 = vmatpush.msrb.mxu1 %v377_v11  ;;  %v360_v31 = vld [vmem:[#allocation7 + $0x170] sm:$0xff]  ;;  %v367_v33 = vld [vmem:[#allocation7 + $0x1a8] sm:$0xff]  ;;  %v326_v34 = vld [vmem:[#allocation7 + $0x60] sm:$0xff]  ;;  %v463_v11 = vstv %s648_s9  ;;  %p867_p8 = pneg %p866_p4 }
  0x47   : > { %382 = vmatpush.msra.mxu2 %v336_v14  ;;  %402 = vmatpush.msra.mxu3 %v368_v15  ;;  %v358_v35 = vld [vmem:[#allocation7 + $0x160] sm:$0xff]  ;;  %v333_v36 = vld [vmem:[#allocation7 + $0x98] sm:$0xff]  ;;  %v324_v38 = vld [vmem:[#allocation7 + $0x50] sm:$0xff] }
  0x48   : > { %419 = vmatpush.msrb.mxu0 %v343_v16  ;;  %439 = vmatpush.msrb.mxu1 %v375_v17  ;;  %v365_v37 = vld [vmem:[#allocation7 + $0x198] sm:$0xff]  ;;  %v356_v39 = vld [vmem:[#allocation7 + $0x150] sm:$0xff]  ;;  %v331_v40 = vld [vmem:[#allocation7 + $0x88] sm:$0xff]  ;;  %p872_p11 = pnand %p871_p2, %p867_p8 }
  0x49   : > { %383 = vmatpush.msra.mxu2 %v334_v18  ;;  %403 = vmatpush.msra.mxu3 %v366_v19  ;;  %v363_v41 = vld [vmem:[#allocation7 + $0x188] sm:$0xff]  ;;  %v322_v42 = vld [vmem:[#allocation7 + $0x40] sm:$0xff]  ;;  %v329_v44 = vld [vmem:[#allocation7 + $0x78] sm:$0xff] }
  0x4a   : > { %420 = vmatpush.msrb.mxu0 %v341_v20  ;;  %440 = vmatpush.msrb.mxu1 %v373_v21  ;;  %v354_v43 = vld [vmem:[#allocation7 + $0x140] sm:$0xff]  ;;  %v361_v45 = vld [vmem:[#allocation7 + $0x178] sm:$0xff]  ;;  %v320_v46 = vld [vmem:[#allocation7 + $0x30] sm:$0xff] }
  0x4b   : > { %384 = vmatpush.msra.mxu2 %v332_v22  ;;  %404 = vmatpush.msra.mxu3 %v364_v23  ;;  %v352_v47 = vld [vmem:[#allocation7 + $0x130] sm:$0xff]  ;;  %v327_v48 = vld [vmem:[#allocation7 + $0x68] sm:$0xff]  ;;  %v318_v50 = vld [vmem:[#allocation7 + $0x20] sm:$0xff] }
  0x4c   : > { %421 = vmatpush.msrb.mxu0 %v339_v24  ;;  %441 = vmatpush.msrb.mxu1 %v371_v25  ;;  %v359_v49 = vld [vmem:[#allocation7 + $0x168] sm:$0xff]  ;;  %v350_v51 = vld [vmem:[#allocation7 + $0x120] sm:$0xff]  ;;  %v325_v52 = vld [vmem:[#allocation7 + $0x58] sm:$0xff] }
  0x4d   : > { %385 = vmatpush.msra.mxu2 %v330_v26  ;;  %405 = vmatpush.msra.mxu3 %v362_v27  ;;  %v357_v53 = vld [vmem:[#allocation7 + $0x158] sm:$0xff]  ;;  %v316_v54 = vld [vmem:[#allocation7 + $0x10] sm:$0xff]  ;;  %v323_v56 = vld [vmem:[#allocation7 + $0x48] sm:$0xff] }
  0x4e   : > { %422 = vmatpush.msrb.mxu0 %v337_v28  ;;  %442 = vmatpush.msrb.mxu1 %v369_v29  ;;  %v348_v55 = vld [vmem:[#allocation7 + $0x110] sm:$0xff]  ;;  %v355_v57 = vld [vmem:[#allocation7 + $0x148] sm:$0xff]  ;;  %v321_v58 = vld [vmem:[#allocation7 + $0x38] sm:$0xff] }
  0x4f   : > { %386 = vmatpush.msra.mxu2 %v328_v30  ;;  %406 = vmatpush.msra.mxu3 %v360_v31  ;;  %v353_v59 = vld [vmem:[#allocation7 + $0x138] sm:$0xff]  ;;  %v319_v60 = vld [vmem:[#allocation7 + $0x28] sm:$0xff]  ;;  %v314_v1 = vld [vmem:[#allocation7] sm:$0xff] }
  0x50   : > { %423 = vmatpush.msrb.mxu0 %v335_v32  ;;  %443 = vmatpush.msrb.mxu1 %v367_v33  ;;  %v351_v61 = vld [vmem:[#allocation7 + $0x128] sm:$0xff]  ;;  %v317_v62 = vld [vmem:[#allocation7 + $0x18] sm:$0xff]  ;;  %v346_v2 = vld [vmem:[#allocation7 + $0x100] sm:$0xff] }
  0x51   : > { %387 = vmatpush.msra.mxu2 %v326_v34  ;;  %407 = vmatpush.msra.mxu3 %v358_v35  ;;  %v349_v63 = vld [vmem:[#allocation7 + $0x118] sm:$0xff]  ;;  %v315_v3 = vld [vmem:[#allocation7 + $0x8] sm:$0xff] }
  0x52   : > { %424 = vmatpush.msrb.mxu0 %v333_v36  ;;  %444 = vmatpush.msrb.mxu1 %v365_v37  ;;  %v347_v4 = vld [vmem:[#allocation7 + $0x108] sm:$0xff] }
  0x53   : > { %388 = vmatpush.msra.mxu2 %v324_v38  ;;  %408 = vmatpush.msra.mxu3 %v356_v39 }
  0x54   : > { %425 = vmatpush.msrb.mxu0 %v331_v40  ;;  %445 = vmatpush.msrb.mxu1 %v363_v41 }
  0x55   : > { %389 = vmatpush.msra.mxu2 %v322_v42  ;;  %409 = vmatpush.msra.mxu3 %v354_v43 }
  0x56   : > { %426 = vmatpush.msrb.mxu0 %v329_v44  ;;  %446 = vmatpush.msrb.mxu1 %v361_v45 }
  0x57   : > { %390 = vmatpush.msra.mxu2 %v320_v46  ;;  %410 = vmatpush.msra.mxu3 %v352_v47 }
  0x58   : > { %427 = vmatpush.msrb.mxu0 %v327_v48  ;;  %447 = vmatpush.msrb.mxu1 %v359_v49 }
  0x59   : > { %391 = vmatpush.msra.mxu2 %v318_v50  ;;  %411 = vmatpush.msra.mxu3 %v350_v51 }
  0x5a   : > { %428 = vmatpush.msrb.mxu0 %v325_v52  ;;  %448 = vmatpush.msrb.mxu1 %v357_v53 }
  0x5b   : > { %392 = vmatpush.msra.mxu2 %v316_v54  ;;  %412 = vmatpush.msra.mxu3 %v348_v55 }
  0x5c   : > { %429 = vmatpush.msrb.mxu0 %v323_v56  ;;  %449 = vmatpush.msrb.mxu1 %v355_v57 }
  0x5d   : > { %393 = vmatpush.msra.mxu2 %v314_v1  ;;  %413 = vmatpush.msra.mxu3 %v346_v2 }
  0x5e   : > { %430 = vmatpush.msrb.mxu0 %v321_v58  ;;  %450 = vmatpush.msrb.mxu1 %v353_v59 }
  0x60   : > { %431 = vmatpush.msrb.mxu0 %v319_v60  ;;  %451 = vmatpush.msrb.mxu1 %v351_v61 }
  0x62   : > { %432 = vmatpush.msrb.mxu0 %v317_v62  ;;  %452 = vmatpush.msrb.mxu1 %v349_v63 }
  0x64   : > { %433 = vmatpush.msrb.mxu0 %v315_v3  ;;  %453 = vmatpush.msrb.mxu1 %v347_v4 }
  0xc2   : > { %v291_v5 = vpop.f32.mrf.mxu0  ;;  %v311_v6 = vpop.f32.mrf.mxu1 }
  0xc3   : > { %394 = vmatmul.f32.vlgmr.msra.gmra.mxu2 %v291_v5  ;;  %414 = vmatmul.f32.vlgmr.msra.gmra.mxu3 %v311_v6 }
  0xc4   : > { %434 = vmatmul.f32.vlgmr.msrb.gmra.mxu0 %v291_v5  ;;  %454 = vmatmul.f32.vlgmr.msrb.gmra.mxu1 %v311_v6 }
 0x141   : > { %v435_v7 = vpop.f32.mrf.mxu0  ;;  %v455_v8 = vpop.f32.mrf.mxu1 }
 0x142   : > { %v456_v10 = vadd.f32 %v455_v8, %v435_v7 }
 0x144   : > { %v461_v12 = vmul.f32 %v459_v9, %v456_v10 }
 0x146   : > { %v465_v13 = vadd.f32 %v463_v11, %v461_v12  ;;  %v395_v14 = vpop.f32.mrf.mxu2  ;;  %v415_v15 = vpop.f32.mrf.mxu3 }
 0x147   : > { %v416_v16 = vadd.f32 %v415_v15, %v395_v14 }
 0x148   : > { %v467_v17 = vsub.f32 0.0, %v465_v13 }
 0x149   : > { %v460_v18 = vmul.f32 %v459_v9, %v416_v16 }
 0x14a   : > { %v470_v19 = vmul.f32 1.442695, %v467_v17 }
 0x14b   : > { %v464_v20 = vadd.f32 %v463_v11, %v460_v18 }
 0x14c   : > { %735 = vpow2.f32 %v470_v19 }
 0x14d   : > { %v466_v21 = vsub.f32 0.0, %v464_v20 }
 0x14f   : > { %v468_v22 = vmul.f32 1.442695, %v466_v21 }
 0x151   : > { %737 = vpow2.f32 %v468_v22 }
 0x152   : > { %v736_v23 = vpop.eup %735 }
 0x153   : > { %v473_v24 = vadd.f32 1.0, %v736_v23 }
 0x155   : > { %739 = vrcp.f32 %v473_v24  ;;  %v499_v30 = vand.u32 2147483648, %v473_v24  ;;  %v497_v33 = vand.u32 2147483647, %v473_v24  ;;  %vm493_vm3 = vweird.f32 %v473_v24 }
 0x157   : > { %v738_v25 = vpop.eup %737  ;;  %v500_v37 = vor.u32 1.1754944e-38, %v499_v30  ;;  %vm498_vm5 = vcmp.eq.f32.partialorder %v497_v33, 8.507059e+37 }
 0x158   : > { %v472_v26 = vadd.f32 1.0, %v738_v25 }
 0x15a   : > { %741 = vrcp.f32 %v472_v26  ;;  %v485_v38 = vand.u32 2147483648, %v472_v26  ;;  %v483_v41 = vand.u32 2147483647, %v472_v26  ;;  %vm479_vm7 = vweird.f32 %v472_v26 }
 0x15b   : > { %v740_v27 = vpop.eup %739 }
 0x15c   : > { %v489_v28 = vmul.f32 %v740_v27, %v473_v24  ;;  %vm494_vm2 = vweird.f32 %v740_v27  ;;  %v486_v45 = vor.u32 1.1754944e-38, %v485_v38  ;;  %vm484_vm9 = vcmp.eq.f32.partialorder %v483_v41, 8.507059e+37 }
 0x15d   : > { %vm495_vm4 = vmor %vm493_vm3, %vm494_vm2 }
 0x15e   : > { %v490_v29 = vsub.f32 1.0, %v489_v28 }
 0x160   : > { %v742_v31 = vpop.eup %741  ;;  %v491_v32 = vmul.f32 %v740_v27, %v490_v29 }
 0x161   : > { %v475_v34 = vmul.f32 %v742_v31, %v472_v26  ;;  %vm480_vm6 = vweird.f32 %v742_v31 }
 0x162   : > { %v492_v35 = vadd.f32 %v740_v27, %v491_v32  ;;  %vm481_vm8 = vmor %vm479_vm7, %vm480_vm6 }
 0x163   : > { %v476_v36 = vsub.f32 1.0, %v475_v34 }
 0x164   : > { %v496_v39 = vsel %vm495_vm4, %v740_v27, %v492_v35 }
 0x165   : > { %v477_v40 = vmul.f32 %v742_v31, %v476_v36  ;;  %v501_v42 = vsel %vm498_vm5, %v500_v37, %v496_v39 }
 0x166   : > { %v503_v44 = vperm.slane %v501_v42, 0 }
 0x167   : > { %v478_v43 = vadd.f32 %v742_v31, %v477_v40 }
 0x168   : > { %v506_v49 = vrot.slane %v503_v44, 4 }
 0x169   : > { %v482_v46 = vsel %vm481_vm8, %v742_v31, %v478_v43 }
 0x16a   : > { %v487_v47 = vsel %vm484_vm9, %v486_v45, %v482_v46 }
 0x16b   : > { %v502_v48 = vperm.slane %v487_v47, 0 }
 0x16d   : > { %v507_v50 = vsel %vm269_vm0, %v502_v48, %v506_v49 }
 0x16e   : > { %v509_v51 = vmul.f32 %v507_v50, %v1082_v0 }
 0x170   : > { %510 = vst [vmem:[%s258_s20] sm:$0xff] %v509_v51 }
 0x171   : > { %875 = shalt.err (!%p872_p11)
}
 0x172   : > { %670 = dma.vmem_to_hbm [thread:$0]  (%p1031_p7), %s526_s23, 128, %s528_s28, %s512_s19  }
 0x173 PF: > { %s539_s27 = sand.u32 1, %s914_s15   ;;  %p1134_p12 = scmp.ge.s32.totalorder %s926_s18, 2 }
 0x174   : > { %s540_s21 = scalar_lea.sflag [#allocation4], %s539_s27 }
 0x175   : > { %p687_p13 = pnand %p1134_p12, %p993_p6 }
 0x177   : > { %p688_p0 = pneg %p687_p13 }
 0x179   : > { %909 = dma.done.wait (%p688_p0), %s540_s21, 128  }
 0x17a   : > { %911 = vsyncadd (%p688_p0), %s540_s21, 4294967168  ;;  %p17_p3 = scmp.ge.s32.totalorder %s1017_s14, 4   ;;  %s1135_s15 = smov %s918_s16 }
 0x17b   : > { %s1136_s16 = smov %s922_s17  ;;  %s1137_s17 = smov %s1027_s24 }
 0x17c   : > { %s1138_s18 = smov %s1017_s14  ;;  %19 = sbr.rel (!%p17_p3) target bundleno = 6 (0x6), region = 93 }
 0x181   :  { %546 = vsyncpa [#allocation3], 1 }
 0x182   :  { %548 = vsyncpa [#allocation3 + $0x1], 1 }
 0x183   :  { %549 = vsyncpa [#allocation8], 1 }
 0x184   :  { %550 = vsyncpa [#allocation4], 1 }
 0x185   :  { %552 = vsyncpa [#allocation4 + $0x1], 1 }
 0x186   :  { %553 = vsyncpa [#allocation5], 1 }
 0x187   :  { %555 = vsyncpa [#allocation5 + $0x1], 1 }

</bundles_post_ra>
